<compile_context>
chip_gen: v6e
topology: v6e:2x2x1
jax: 0.10.0
libtpu: 0.0.40
codegen_flags: <defaults>
</compile_context>

<pallas_src>
import math

import jax
import jax.numpy as jnp
from jax.experimental import pallas as pl
from jax.experimental.pallas import tpu as pltpu

_TWO_PI = 2.0 * math.pi
_LANES = 128                          # lane-dense last dim
_TARGET_BLOCK_BYTES = 4 * 1024 * 1024 # ~4 MiB per block
_VMEM_LIMIT_BYTES = 32 * 1024 * 1024  # keep full double-buffering on v5e too


def _policy_kernel(states_ref, out_ref):
    # Elementwise hot path: 2*pi*cos(2*pi*x). Compute in f32, cast on store.
    x = states_ref[...].astype(jnp.float32)
    out_ref[...] = (_TWO_PI * jnp.cos(_TWO_PI * x)).astype(out_ref.dtype)


def _round_up(x, m):
    return ((x + m - 1) // m) * m


def _choose_block_rows(rows, sub, itemsize):
    """Pick a block row count: ~4 MiB budget, sublane-aligned, >=2 grid steps."""
    budget_rows = max(sub, (_TARGET_BLOCK_BYTES // (_LANES * itemsize)) // sub * sub)
    if rows <= sub:
        # Tiny input: one block equal to the full extent (allowed by Mosaic).
        return rows
    # Keep at least 2 grid steps so both of v7x's TensorCores get work.
    two_step_rows = _round_up(pl.cdiv(rows, 2), sub)
    return min(budget_rows, two_step_rows)


def optimal_swarm_1d_policy(states, mu=None, explore=None):
    """Pallas equivalent of OptimalSwarm1DPolicy.forward.

    `mu` and `explore` are ignored (matching the reference module).
    `states` may have any shape and any float dtype; output matches it exactly.
    """
    del mu, explore  # unused, as in the PyTorch reference

    orig_shape = states.shape
    dtype = states.dtype
    if not jnp.issubdtype(dtype, jnp.floating):
        raise TypeError(
            f"optimal_swarm_1d_policy expects a floating dtype, got {dtype}")

    flat = states.reshape(-1)
    total = flat.size
    if total == 0:
        return states  # empty in, empty out

    itemsize = jnp.dtype(dtype).itemsize
    sub = max(8, 32 // itemsize)  # 8 for f32, 16 for bf16/f16

    # Lane-dense (rows, 128) slab. Pad only to the next multiple of 128
    # elements; aligned inputs take a zero-copy path (pure reshape).
    rows = pl.cdiv(total, _LANES)
    padded_total = rows * _LANES
    if padded_total != total:
        flat = jnp.pad(flat, (0, padded_total - total))
    slab = flat.reshape(rows, _LANES)

    block_rows = _choose_block_rows(rows, sub, itemsize)
    grid = (pl.cdiv(rows, block_rows),)  # partial trailing block handled by Pallas

    out2d = pl.pallas_call(
        _policy_kernel,
        out_shape=jax.ShapeDtypeStruct((rows, _LANES), dtype),
        grid=grid,
        in_specs=[pl.BlockSpec((block_rows, _LANES), lambda i: (i, 0))],
        out_specs=pl.BlockSpec((block_rows, _LANES), lambda i: (i, 0)),
        compiler_params=pltpu.CompilerParams(
            dimension_semantics=("parallel",),
            vmem_limit_bytes=_VMEM_LIMIT_BYTES,
        ),
    )(slab)

    out_flat = out2d.reshape(-1)
    if padded_total != total:
        out_flat = out_flat[:total]
    return out_flat.reshape(orig_shape)


if __name__ == "__main__":
    key = jax.random.PRNGKey(0)
    k1, k2, k3, k4 = jax.random.split(key, 4)
    ok = True

    def ref(x):
        xf = x.astype(jnp.float32)
        return (2.0 * jnp.pi * jnp.cos(2.0 * jnp.pi * xf)).astype(x.dtype)

    mu = jax.random.uniform(k2, (128,), dtype=jnp.float32)  # unused mean-field input

    # Case 1: typical 1D-swarm shape (100 agents, state_dim=1) -> small pad path.
    states1 = jax.random.uniform(k1, (100, 1), dtype=jnp.float32)
    out1 = jax.block_until_ready(optimal_swarm_1d_policy(states1, mu))
    ok &= out1.shape == states1.shape and out1.dtype == states1.dtype
    ok &= bool(jnp.allclose(out1, ref(states1), atol=1e-5, rtol=1e-5))

    # Case 2: lane-aligned f32 batch -> zero-copy fast path (no pad, no slice).
    states2 = jax.random.uniform(k3, (16, 128), dtype=jnp.float32)
    out2 = jax.block_until_ready(optimal_swarm_1d_policy(states2, mu, explore=0.1))
    ok &= out2.shape == states2.shape and out2.dtype == states2.dtype
    ok &= bool(jnp.allclose(out2, ref(states2), atol=1e-5, rtol=1e-5))

    # Case 3: multi-step grid with a partial trailing block (rows=20, block=16).
    states3 = jax.random.uniform(k4, (2560,), dtype=jnp.float32)
    out3 = jax.block_until_ready(optimal_swarm_1d_policy(states3, mu))
    ok &= out3.shape == states3.shape and out3.dtype == states3.dtype
    ok &= bool(jnp.allclose(out3, ref(states3), atol=1e-5, rtol=1e-5))

    # Case 4: bf16 input -> f32 compute inside the kernel, cast back on store.
    states4 = states1.astype(jnp.bfloat16)
    out4 = jax.block_until_ready(optimal_swarm_1d_policy(states4, mu))
    ok &= out4.shape == states4.shape and out4.dtype == jnp.bfloat16
    ok &= bool(jnp.allclose(out4.astype(jnp.float32),
                            ref(states4).astype(jnp.float32),
                            atol=5e-2, rtol=5e-2))

    assert ok
    print("KERNEL_OK")
</pallas_src>

<mosaic_0001>
module attributes {stable_mosaic.version = 11 : i64} {
  func.func @_policy_kernel(%arg0: i32, %arg1: memref<1x128xf32, #tpu.memory_space<vmem>>, %arg2: memref<1x128xf32, #tpu.memory_space<vmem>>) attributes {dimension_semantics = [#tpu.dimension_semantics<parallel>], iteration_bounds = array<i64: 1>, scalar_prefetch = 0 : i64, scratch_operands = 0 : i64, tpu.core_type = #tpu.core_type<tc>, window_params = [{transform_indices = @transform_0, window_bounds = array<i64: 1, 128>}, {transform_indices = @transform_1, window_bounds = array<i64: 1, 128>}]} {
    %c0 = arith.constant 0 : index
    %c0_0 = arith.constant 0 : index
    %0 = vector.load %arg1[%c0, %c0_0] : memref<1x128xf32, #tpu.memory_space<vmem>>, vector<1x128xf32>
    %cst = arith.constant 6.28318548 : f32
    %1 = vector.broadcast %cst : f32 to vector<1x128xf32>
    %2 = arith.mulf %1, %0 : vector<1x128xf32>
    %3 = math.cos %2 : vector<1x128xf32>
    %cst_1 = arith.constant 6.28318548 : f32
    %4 = vector.broadcast %cst_1 : f32 to vector<1x128xf32>
    %5 = arith.mulf %4, %3 : vector<1x128xf32>
    %c0_2 = arith.constant 0 : index
    %c0_3 = arith.constant 0 : index
    %6 = vector.load %arg2[%c0_2, %c0_3] : memref<1x128xf32, #tpu.memory_space<vmem>>, vector<1x128xf32>
    tpu.vector_store %arg2[%c0_2, %c0_3], %5 {strides = array<i32>} : memref<1x128xf32, #tpu.memory_space<vmem>>, vector<1x128xf32>,
    return
  }
  func.func @transform_0(%arg0: i32) -> (i32, i32) {
    %c0_i32 = arith.constant 0 : i32
    %c0_i32_0 = arith.constant 0 : i32
    return %arg0, %c0_i32 : i32, i32
  }
  func.func @transform_1(%arg0: i32) -> (i32, i32) {
    %c0_i32 = arith.constant 0 : i32
    %c0_i32_0 = arith.constant 0 : i32
    return %arg0, %c0_i32 : i32, i32
  }
}

</mosaic_0001>

<bundles_post_ra>
// kernel: tpu_custom_call.1
= control target key start
LH: loop header
LB: loop body
LE: loop exit
PB: predicated region body
PF: predicated region fallthrough
CT: control target
= control target key end

     0   :  { %6 = vsyncpa [#allocation3], 0  ;;  %s252_s0 = inlined_call_operand.hbm [shape: f32[1,128], index: 0, kind: input, shape index: {}]   ;;  %s253_s1 = inlined_call_operand.hbm [shape: f32[1,128], index: 1, kind: output, shape index: {}]  }
   0x1   :  { %7 = vsyncpa [#allocation4], 0  ;;  %s207_s6 = smov [#allocation2]  }
   0x2   :  { %s14_s7 = sshll.u32 %s207_s6, 4  ;;  %s15_s7 = int_to_ptr.vmem [resolvable:$true] %s14_s7 }
   0x3   :  { %s171_s8 = scalar_lea.vmem %s15_s7, 16  ;;  %s175_s9 = scalar_lea.vmem %s15_s7, 32 }
   0x4   :  { %p172_p0 = scmp.ne.s32.totalorder %s15_s7, %s171_s8  ;;  %p176_p1 = scmp.lt.s32.totalorder %s15_s7, %s15_s7 }
   0x5   :  { %p177_p2 = scmp.lt.s32.totalorder %s175_s9, %s171_s8 }
   0x7   :  { %p178_p3 = por %p177_p2, %p176_p1 }
   0x9   :  { %p179_p4 = pnand %p178_p3, %p172_p0 }
   0xb   :  { %182 = shalt.err (!%p179_p4)
}
   0xc   :  { %17 = dma.hbm_to_vmem [thread:$0]  %s252_s0, 16, %s15_s7, [#allocation3]  }
   0xd   :  { %203 = dma.done.wait [#allocation3], 16  }
   0xe   :  { %204 = vsyncadd [#allocation3], 4294967280  ;;  %v21_v0 = vld [vmem:[#allocation2] sm:$0x1]  ;;  %v208_v13 = vmov 683565275  }
   0xf   :  { %v228_v1 = vmul.f32 6.2831855, %v21_v0  ;;  %v209_v15 = vmov 2475754826   ;;  %v210_v17 = vmov 2131351028  }
  0x10   :  { %v211_v19 = vmov 2102212464   ;;  %v212_v21 = vmov 920167782   ;;  %v213_v28 = vmov 1326507024  }
  0x11   :  { %v26_v2 = vand.u32 2139095040, %v228_v1  ;;  %v23_v4 = vand.u32 2147483647, %v228_v1  ;;  %vm25_vm7 = vcmp.lt.s32.totalorder %v228_v1, 0  ;;  %vm115_vm12 = vweird.f32 %v228_v1  ;;  %s214_s0 = smov [#allocation5]  }
  0x12   :  { %s134_s12 = sshll.u32 %s214_s0, 4  ;;  %s135_s12 = int_to_ptr.vmem [resolvable:$true] %s134_s12 }
  0x13   :  { %v27_v3 = vshrl.u32 %v26_v2, 23  ;;  %v30_v7 = vand.u32 8388607, %v23_v4  ;;  %vm24_vm8 = vcmp.le.f32.partialorder %v23_v4, 0.7853982  ;;  %s183_s13 = scalar_lea.vmem %s135_s12, 16  ;;  %p188_p6 = scmp.lt.s32.totalorder %s135_s12, %s135_s12 }
  0x14   :  { %p184_p5 = scmp.ne.s32.totalorder %s135_s12, %s183_s13  ;;  %s187_s14 = scalar_lea.vmem %s135_s12, 32 }
  0x15   :  { %v143_v5 = vadd.s32 4294967169, %v27_v3  ;;  %v31_v10 = vor.u32 8388608, %v30_v7  ;;  %p189_p7 = scmp.lt.s32.totalorder %s187_s14, %s183_s13 }
  0x17   :  { %v33_v6 = vadd.s32 1, %v143_v5  ;;  %v71_v30 = vshll.u32 %v31_v10, 8  ;;  %p190_p8 = por %p189_p7, %p188_p6 }
  0x19   :  { %vm34_vm0 = vcmp.gt.s32.totalorder %v33_v6, 0  ;;  %p191_p9 = pnand %p190_p8, %p184_p5 }
  0x1a   :  { %v35_v8 = vsel %vm34_vm0, %v33_v6, 0 }
  0x1b   :  { %v37_v9 = vand.u32 31, %v35_v8  ;;  %v36_v11 = vshrl.u32 %v35_v8, 5 }
  0x1d   :  { %v38_v12 = vsub.s32 32, %v37_v9  ;;  %v40_v14 = vshll.u32 %v208_v13, %v37_v9  ;;  %v43_v16 = vshll.u32 %v209_v15, %v37_v9  ;;  %v46_v18 = vshll.u32 %v210_v17, %v37_v9 }
  0x1e   :  { %v49_v20 = vshll.u32 %v211_v19, %v37_v9  ;;  %v52_v22 = vshll.u32 %v212_v21, %v37_v9  ;;  %vm55_vm1 = vcmp.lt.s32.totalorder %v36_v11, 1  ;;  %vm58_vm2 = vcmp.lt.s32.totalorder %v36_v11, 4 }
  0x1f   :  { %v39_v23 = vshrl.u32 %v208_v13, %v38_v12  ;;  %v41_v24 = vshrl.u32 %v209_v15, %v38_v12  ;;  %v44_v25 = vshrl.u32 %v210_v17, %v38_v12  ;;  %v47_v26 = vshrl.u32 %v211_v19, %v38_v12 }
  0x20   :  { %v50_v27 = vshrl.u32 %v212_v21, %v38_v12  ;;  %v53_v29 = vshrl.u32 %v213_v28, %v38_v12  ;;  %vm56_vm3 = vcmp.lt.s32.totalorder %v36_v11, 2  ;;  %vm57_vm4 = vcmp.lt.s32.totalorder %v36_v11, 3 }
  0x21   :  { %v42_v31 = vor.u32 %v41_v24, %v40_v14  ;;  %v45_v32 = vor.u32 %v44_v25, %v43_v16  ;;  %v48_v33 = vor.u32 %v47_v26, %v46_v18 }
  0x22   :  { %v51_v34 = vor.u32 %v50_v27, %v49_v20  ;;  %v54_v35 = vor.u32 %v53_v29, %v52_v22 }
  0x23   :  { %v59_v36 = vsel %vm55_vm1, %v39_v23, %v42_v31  ;;  %v60_v37 = vsel %vm58_vm2, %v48_v33, 2102212464  ;;  %v63_v38 = vsel %vm55_vm1, %v42_v31, %v45_v32  ;;  %v67_v39 = vsel %vm55_vm1, %v45_v32, %v48_v33 }
  0x24   :  { %v61_v40 = vsel %vm57_vm4, %v45_v32, %v60_v37  ;;  %v64_v41 = vsel %vm58_vm2, %v51_v34, 920167782  ;;  %v68_v42 = vsel %vm58_vm2, %v54_v35, 1326507024 }
  0x25   :  { %v65_v43 = vsel %vm57_vm4, %v48_v33, %v64_v41  ;;  %v69_v44 = vsel %vm57_vm4, %v51_v34, %v68_v42  ;;  %v62_v45 = vsel %vm56_vm3, %v59_v36, %v61_v40 }
  0x26   :  { %v66_v46 = vsel %vm56_vm3, %v63_v38, %v65_v43  ;;  %v70_v47 = vsel %vm56_vm3, %v67_v39, %v69_v44  ;;  %v78_v52 = vmul.u32 %v71_v30, %v62_v45 }
  0x27   :  { %v234_v48 = vmul.u32.u64.low %v71_v30, %v70_v47  ;;  %v235_v49 = vmul.u32.u64.high %v71_v30, %v70_v47, %v234_v48  ;;  %v237_v50 = vmul.u32.u64.low %v71_v30, %v66_v46  ;;  %v238_v51 = vmul.u32.u64.high %v71_v30, %v66_v46, %v237_v50 }
  0x29   :  { %vm80_vm5 = vc.u32 %v235_v49, %v237_v50  ;;  %v81_v53 = vadd.s32 1, %v238_v51  ;;  %v79_v0 = vadd.s32 %v237_v50, %v235_v49 }
  0x2b   :  { %v82_v54 = vsel %vm80_vm5, %v81_v53, %v238_v51 }
  0x2c   :  { %v83_v55 = vadd.s32 %v82_v54, %v78_v52 }
  0x2e   :  { %v84_v56 = vadd.s32 536870912, %v83_v55 }
  0x30   :  { %v85_v57 = vshrl.u32 %v84_v56, 30 }
  0x32   :  { %v86_v58 = vshll.u32 %v85_v57, 30  ;;  %v109_v17 = vsub.s32 4, %v85_v57 }
  0x34   :  { %v87_v59 = vsub.s32 %v83_v55, %v86_v58  ;;  %v110_v19 = vsel %vm25_vm7, %v109_v17, %v85_v57 }
  0x35   :  { %v112_v20 = vsel %vm24_vm8, 0, %v110_v19 }
  0x36   :  { %v89_v60 = vsub.s32 0, %v87_v59  ;;  %v116_v21 = vand.u32 3, %v112_v20 }
  0x38   :  { %v144_v61 = vmin.u32 %v89_v60, %v87_v59  ;;  %vm121_vm9 = vcmp.eq.s32.totalorder %v116_v21, 2  ;;  %vm118_vm10 = vcmp.eq.s32.totalorder %v116_v21, 0  ;;  %vm117_vm11 = vcmp.lt.s32.totalorder %v116_v21, 2 }
  0x3a   :  { %v91_v62 = vclz %v144_v61 }
  0x3c   :  { %v145_v63 = vadd.s32 4294967294, %v91_v62 }
  0x3e   :  { %vm146_vm6 = vcmp.lt.s32.totalorder %v145_v63, 0 }
  0x3f   :  { %v94_v2 = vsel %vm146_vm6, 0, %v145_v63 }
  0x40   :  { %v95_v3 = vsub.s32 32, %v94_v2  ;;  %v96_v5 = vshll.u32 %v87_v59, %v94_v2  ;;  %v99_v6 = vsub.s32 4294967266, %v94_v2 }
  0x42   :  { %v97_v7 = vshrl.u32 %v79_v0, %v95_v3  ;;  %v100_v8 = vadd.s32 127, %v99_v6 }
  0x44   :  { %v98_v9 = vor.u32 %v97_v7, %v96_v5  ;;  %v101_v10 = vshll.u32 %v100_v8, 23 }
  0x46   :  { %v102_v11 = vor.u32 4788187, %v101_v10  ;;  %v105_v12 = vcvt.s32.f32 %v98_v9 }
  0x48   :  { %v103_v13 = vand.u32 2147483647, %v102_v11 }
  0x4a   :  { %v106_v14 = vmul.f32 %v105_v12, %v103_v13 }
  0x4c   :  { %v107_v15 = vxor.u32 2147483648, %v106_v14 }
  0x4e   :  { %v108_v16 = vsel %vm25_vm7, %v107_v15, %v106_v14 }
  0x4f   :  { %v111_v18 = vsel %vm24_vm8, %v228_v1, %v108_v16 }
  0x50   :  { %159 = vcosq.f32 %v111_v18 }
  0x51   :  { %161 = vsinq.f32 %v111_v18 }
  0x5d   :  { %v160_v22 = vpop.eup %159 }
  0x5e   :  { %v162_v23 = vpop.eup %161  ;;  %v122_v24 = vxor.u32 2147483648, %v160_v22 }
  0x5f   :  { %v119_v25 = vxor.u32 2147483648, %v162_v23 }
  0x60   :  { %v123_v4 = vsel %vm121_vm9, %v122_v24, %v162_v23 }
  0x61   :  { %v120_v26 = vsel %vm118_vm10, %v160_v22, %v119_v25 }
  0x62   :  { %v124_v27 = vsel %vm117_vm11, %v120_v26, %v123_v4 }
  0x63   :  { %v125_v28 = vsel %vm115_vm12, nan, %v124_v27 }
  0x64   :  { %v126_v29 = vmul.f32 6.2831855, %v125_v28 }
  0x66   :  { %127 = vst [vmem:[#allocation5] sm:$0x1] %v126_v29 }
  0x67   :  { %194 = shalt.err (!%p191_p9)
}
  0x68   :  { %137 = dma.vmem_to_hbm [thread:$0]  %s135_s12, 16, %s253_s1, [#allocation4]  }
  0x69   :  { %205 = dma.done.wait [#allocation4], 16  }
  0x6a   :  { %206 = vsyncadd [#allocation4], 4294967280 }
  0x6b   :  { %141 = vsyncpa [#allocation3], 1 }
  0x6c   :  { %142 = vsyncpa [#allocation4], 1 }

</bundles_post_ra>
